<compile_context>
chip_gen: v7x
topology: tpu7x:2x2x1
jax: 0.10.0
libtpu: 0.0.40
codegen_flags: <defaults>
</compile_context>

<pallas_src>
import jax
import jax.numpy as jnp
from jax.experimental import pallas as pl
from jax.experimental.pallas import tpu as pltpu


def _round_up(x, m):
    return (x + m - 1) // m * m


def _patch_embed_kernel(p_ref, w_ref, b_ref, o_ref):
    # p_ref: (tm, Kp) bf16 patch tile; w_ref: (Kp, te) bf16 weight tile;
    # b_ref: (1, te) f32 bias tile.  MXU matmul with f32 accumulation,
    # bias add in f32, then cast to the (lane-dense) output tile dtype.
    acc = jnp.dot(p_ref[...], w_ref[...], preferred_element_type=jnp.float32)
    o_ref[...] = (acc + b_ref[...]).astype(o_ref.dtype)


def patch_embed_forward(x, weight, bias, *, patch_size, tubelet_size,
                        tm=512, out_dtype=jnp.bfloat16):
    """PatchEmbed forward.

    x:      (B, C, T, H, W) float32 (PyTorch NCTHW layout)
    weight: (E, C, t, ph, pw) Conv3d weight
    bias:   (E,)
    returns (B, N, E)  ==  proj(x).flatten(2).transpose(1, 2)   (dtype out_dtype)
    """
    B, C, T, H, W = x.shape
    ph, pw = patch_size
    t = tubelet_size
    E = weight.shape[0]
    assert H % ph == 0 and W % pw == 0 and T % t == 0

    Tp, Hp, Wp = T // t, H // ph, W // pw
    N = Tp * Hp * Wp
    K = C * t * ph * pw
    M = B * N

    # --- glue: non-overlapping tubelet/patch extraction (reshape/transpose).
    # Cast to bf16 BEFORE the transpose so the im2col materialization moves
    # half the HBM bytes; ordering (C, t, ph, pw) matches the Conv3d weight.
    # TODO(synk): fold patchify into the kernel grid (stream x HBM->VMEM once);
    # small (ph, pw) windows are not lane/sublane-aligned BlockSpec tiles with
    # NCTHW input, so the im2col stays in XLA for now.
    xr = x.astype(jnp.bfloat16).reshape(B, C, Tp, t, Hp, ph, Wp, pw)
    xr = xr.transpose(0, 2, 4, 6, 1, 3, 5, 7)
    patches = xr.reshape(M, K)
    w_mat = weight.reshape(E, K).T.astype(jnp.bfloat16)        # (K, E)

    # --- hardware-aware VMEM budget (v7x has 64 MiB, v5e/v6e have 128 MiB).
    try:
        vmem_cap = int(pltpu.get_tpu_info().vmem_capacity_bytes)
    except Exception:
        vmem_cap = 64 << 20                                    # safe lower bound
    budget = int(vmem_cap * 0.7)

    Kp = _round_up(K, 128)
    Ep = _round_up(E, 128)
    out_bytes = jnp.dtype(out_dtype).itemsize

    # Big M tiles (step overhead ~0.35 us); never larger than the problem.
    tm = max(16, min(tm, _round_up(M, 16)))                    # bf16 sublane pack

    def vmem_need(tm_, te_):
        # Conservative: count every operand double-buffered.
        return (2 * tm_ * Kp * 2          # patch tiles (bf16)
                + 2 * Kp * te_ * 2        # weight tiles (bf16)
                + 2 * te_ * 4             # bias tiles (f32)
                + 2 * tm_ * te_ * out_bytes)

    # Preferred: whole embedding dim resident (weight fetched once, 1-D grid).
    while tm > 256 and vmem_need(tm, Ep) > budget:
        tm = _round_up(tm // 2, 16)

    if vmem_need(tm, Ep) <= budget:
        te = Ep
    else:
        # Fallback: tile E with a 256-granular tile (fills the v6e/v7x MXU);
        # pad Ep UP to a multiple of te instead of collapsing te via gcd.
        te = 512 if Ep > 512 else Ep
        while te > 256 and vmem_need(tm, te) > budget:
            te //= 2
        Ep = _round_up(Ep, te)

    Mp = _round_up(M, tm)

    patches_p = patches if (Mp == M and Kp == K) else jnp.pad(
        patches, ((0, Mp - M), (0, Kp - K)))
    w_p = w_mat if (Kp == K and Ep == E) else jnp.pad(
        w_mat, ((0, Kp - K), (0, Ep - E)))
    b_p = bias.astype(jnp.float32)
    b_p = (b_p if Ep == E else jnp.pad(b_p, (0, Ep - E))).reshape(1, Ep)

    if te == Ep:
        # 1-D grid over M tiles; weight/bias block index constant -> DMA'd once.
        grid = (Mp // tm,)
        in_specs = [
            pl.BlockSpec((tm, Kp), lambda i: (i, 0)),          # patch stream
            pl.BlockSpec((Kp, Ep), lambda i: (0, 0)),          # resident weight
            pl.BlockSpec((1, Ep), lambda i: (0, 0)),           # resident bias
        ]
        out_specs = pl.BlockSpec((tm, Ep), lambda i: (i, 0))
        dims = ("parallel",)
    else:
        # M outer / E inner: the larger (M, K) patch matrix streams exactly once.
        grid = (Mp // tm, Ep // te)
        in_specs = [
            pl.BlockSpec((tm, Kp), lambda i, j: (i, 0)),
            pl.BlockSpec((Kp, te), lambda i, j: (0, j)),
            pl.BlockSpec((1, te), lambda i, j: (0, j)),
        ]
        out_specs = pl.BlockSpec((tm, te), lambda i, j: (i, j))
        dims = ("parallel", "parallel")

    vmem_limit = int(min(max(vmem_need(tm, te) * 5 // 4, 32 << 20),
                         vmem_cap * 3 // 4))

    out = pl.pallas_call(
        _patch_embed_kernel,
        out_shape=jax.ShapeDtypeStruct((Mp, Ep), out_dtype),
        grid_spec=pltpu.PrefetchScalarGridSpec(
            num_scalar_prefetch=0,
            grid=grid,
            in_specs=in_specs,
            out_specs=out_specs,
        ),
        compiler_params=pltpu.CompilerParams(
            dimension_semantics=dims,
            vmem_limit_bytes=vmem_limit),
    )(patches_p, w_p, b_p)

    if Mp != M or Ep != E:
        out = out[:M, :E]
    return out.reshape(B, N, E)


if __name__ == "__main__":
    # Small config consistent with PatchEmbed semantics:
    #   img_size=16, patch_size=8, in_chans=4, embed_dim=32,
    #   num_frames=4, tubelet_size=2  ->  num_patches = 2*2*2 = 8
    B, C, T, H, W = 2, 4, 4, 16, 16
    patch_size = (8, 8)
    tubelet = 2
    embed_dim = 32
    K = C * tubelet * patch_size[0] * patch_size[1]

    key = jax.random.PRNGKey(0)
    kx, kw, kb = jax.random.split(key, 3)
    x = jax.random.normal(kx, (B, C, T, H, W), dtype=jnp.float32)
    # deterministic "Conv3d" params, PyTorch layout (E, C, t, ph, pw)
    weight = jax.random.normal(kw, (embed_dim, C, tubelet, *patch_size),
                               dtype=jnp.float32) * 0.02
    bias = jax.random.normal(kb, (embed_dim,), dtype=jnp.float32) * 0.02

    out = patch_embed_forward(x, weight, bias,
                              patch_size=patch_size, tubelet_size=tubelet)
    out = jax.block_until_ready(out)

    # reference: same patch extraction, same bf16-quantized operands, f32 accumulate
    xr = x.reshape(B, C, T // tubelet, tubelet,
                   H // patch_size[0], patch_size[0],
                   W // patch_size[1], patch_size[1])
    xr = xr.transpose(0, 2, 4, 6, 1, 3, 5, 7).reshape(B, -1, K)
    ref = jnp.einsum(
        "bnk,ek->bne",
        xr.astype(jnp.bfloat16).astype(jnp.float32),
        weight.reshape(embed_dim, K).astype(jnp.bfloat16).astype(jnp.float32),
        precision=jax.lax.Precision.HIGHEST) + bias

    N = (T // tubelet) * (H // patch_size[0]) * (W // patch_size[1])
    assert out.shape == (B, N, embed_dim)
    out_f32 = out.astype(jnp.float32)
    err = float(jnp.max(jnp.abs(out_f32 - ref)))
    # bf16 output rounding on top of bf16-operand matmul -> looser tolerance
    assert jnp.allclose(out_f32, ref, atol=2e-2, rtol=2e-2), err

    print("KERNEL_OK")
</pallas_src>

<mosaic_0001>
module attributes {stable_mosaic.version = 11 : i64} {
  func.func @_patch_embed_kernel(%arg0: i32, %arg1: memref<16x512xbf16, #tpu.memory_space<vmem>>, %arg2: memref<512x128xbf16, #tpu.memory_space<vmem>>, %arg3: memref<1x128xf32, #tpu.memory_space<vmem>>, %arg4: memref<16x128xbf16, #tpu.memory_space<vmem>>) attributes {dimension_semantics = [#tpu.dimension_semantics<parallel>], iteration_bounds = array<i64: 1>, scalar_prefetch = 0 : i64, scratch_operands = 0 : i64, tpu.core_type = #tpu.core_type<tc>, window_params = [{transform_indices = @transform_0, window_bounds = array<i64: 16, 512>}, {pipeline_mode = #tpu.pipeline_mode<synchronous>, transform_indices = @transform_1, window_bounds = array<i64: 512, 128>}, {pipeline_mode = #tpu.pipeline_mode<synchronous>, transform_indices = @transform_2, window_bounds = array<i64: 1, 128>}, {transform_indices = @transform_3, window_bounds = array<i64: 16, 128>}]} {
    %c0 = arith.constant 0 : index
    %c0_0 = arith.constant 0 : index
    %0 = vector.load %arg1[%c0, %c0_0] : memref<16x512xbf16, #tpu.memory_space<vmem>>, vector<16x512xbf16>
    %c0_1 = arith.constant 0 : index
    %c0_2 = arith.constant 0 : index
    %1 = vector.load %arg2[%c0_1, %c0_2] : memref<512x128xbf16, #tpu.memory_space<vmem>>, vector<512x128xbf16>
    %cst = arith.constant dense<0.000000e+00> : vector<16x128xf32>
    %2 = tpu.matmul %0, %1, %cst {dimension_numbers = #tpu.dot_dimension_numbers<[1], [0], [0], [1], [0, 0, 1, 1], [], []>} : vector<16x512xbf16>, vector<512x128xbf16>, vector<16x128xf32> -> vector<16x128xf32>
    %c0_3 = arith.constant 0 : index
    %c0_4 = arith.constant 0 : index
    %3 = vector.load %arg3[%c0_3, %c0_4] : memref<1x128xf32, #tpu.memory_space<vmem>>, vector<1x128xf32>
    %4 = vector.broadcast %3 : vector<1x128xf32> to vector<16x128xf32>
    %5 = arith.addf %2, %4 : vector<16x128xf32>
    %6 = arith.truncf %5 : vector<16x128xf32> to vector<16x128xbf16>
    %c0_5 = arith.constant 0 : index
    %c0_6 = arith.constant 0 : index
    %7 = vector.load %arg4[%c0_5, %c0_6] : memref<16x128xbf16, #tpu.memory_space<vmem>>, vector<16x128xbf16>
    tpu.vector_store %arg4[%c0_5, %c0_6], %6 {strides = array<i32>} : memref<16x128xbf16, #tpu.memory_space<vmem>>, vector<16x128xbf16>,
    return
  }
  func.func @transform_0(%arg0: i32) -> (i32, i32) {
    %c0_i32 = arith.constant 0 : i32
    %c0_i32_0 = arith.constant 0 : i32
    return %arg0, %c0_i32 : i32, i32
  }
  func.func @transform_1(%arg0: i32) -> (i32, i32) {
    %c0_i32 = arith.constant 0 : i32
    %c0_i32_0 = arith.constant 0 : i32
    %c0_i32_1 = arith.constant 0 : i32
    return %c0_i32, %c0_i32_0 : i32, i32
  }
  func.func @transform_2(%arg0: i32) -> (i32, i32) {
    %c0_i32 = arith.constant 0 : i32
    %c0_i32_0 = arith.constant 0 : i32
    %c0_i32_1 = arith.constant 0 : i32
    return %c0_i32, %c0_i32_0 : i32, i32
  }
  func.func @transform_3(%arg0: i32) -> (i32, i32) {
    %c0_i32 = arith.constant 0 : i32
    %c0_i32_0 = arith.constant 0 : i32
    return %arg0, %c0_i32 : i32, i32
  }
}

</mosaic_0001>

<bundles_post_ra>
// kernel: tpu_custom_call.1
= control target key start
LH: loop header
LB: loop body
LE: loop exit
PB: predicated region body
PF: predicated region fallthrough
CT: control target
= control target key end

     0   :  { %8 = vsyncpa [#allocation3], 0  ;;  %s720_s0 = inlined_call_operand.hbm [shape: bf16[16,512], index: 0, kind: input, shape index: {}]   ;;  %s721_s1 = inlined_call_operand.hbm [shape: bf16[512,128], index: 1, kind: input, shape index: {}]   ;;  %s722_s2 = inlined_call_operand.vmem [shape: f32[1,128], index: 2, kind: input, shape index: {}]   ;;  %s723_s3 = inlined_call_operand.hbm [shape: bf16[16,128], index: 3, kind: output, shape index: {}]  }
   0x1   :  { %9 = vsyncpa [#allocation6], 0 }
   0x2   :  { %10 = vsyncpa [#allocation4], 0  ;;  %s648_s12 = smov [#allocation2]   ;;  %s576_s16 = scalar_lea.hbm %s720_s0, 512 }
   0x3   :  { %s16_s13 = sshll.u32 %s648_s12, 4  ;;  %p577_p0 = scmp.ne.s32.totalorder %s720_s0, %s576_s16  ;;  %s17_s13 = int_to_ptr.vmem [resolvable:$true] %s16_s13 }
   0x4   :  { %p580_p1 = scmp.lt.u32.totalorder %s576_s16, %s720_s0 }
   0x6   :  { %p582_p2 = pnand %p580_p1, %p577_p0 }
   0x8   :  { %585 = shalt.err (!%p582_p2)
}
   0x9   :  { %s586_s21 = scalar_lea.vmem %s17_s13, 512  ;;  %p591_p4 = scmp.lt.s32.totalorder %s17_s13, %s17_s13 }
   0xa   :  { %p587_p3 = scmp.ne.s32.totalorder %s17_s13, %s586_s21  ;;  %p592_p5 = scmp.lt.s32.totalorder %s586_s21, %s586_s21 }
   0xc   :  { %p593_p6 = por %p592_p5, %p591_p4 }
   0xe   :  { %p594_p7 = pnand %p593_p6, %p587_p3 }
  0x10   :  { %597 = shalt.err (!%p594_p7)
}
  0x11   :  { %s649_s22 = smov 256   ;;  %s650_s23 = smov 16  }
  0x12   :  { %22 = dma.hbm_to_vmem [thread:$0]  %s720_s0, 512, %s17_s13, [#allocation3], %s649_s22, %s649_s22, %s650_s23  }
  0x13   :  { %s651_s26 = smov [#allocation5]   ;;  %s598_s30 = scalar_lea.hbm %s721_s1, 4096 }
  0x14   :  { %s28_s27 = sshll.u32 %s651_s26, 4  ;;  %p599_p8 = scmp.ne.s32.totalorder %s721_s1, %s598_s30  ;;  %s29_s27 = int_to_ptr.vmem [resolvable:$true] %s28_s27 }
  0x15   :  { %p602_p9 = scmp.lt.u32.totalorder %s598_s30, %s721_s1 }
  0x17   :  { %p604_p10 = pnand %p602_p9, %p599_p8 }
  0x19   :  { %607 = shalt.err (!%p604_p10)
}
  0x1a   :  { %s608_s8 = scalar_lea.vmem %s29_s27, 4096  ;;  %p613_p12 = scmp.lt.s32.totalorder %s29_s27, %s29_s27 }
  0x1b   :  { %p609_p11 = scmp.ne.s32.totalorder %s29_s27, %s608_s8  ;;  %p614_p13 = scmp.lt.s32.totalorder %s608_s8, %s608_s8 }
  0x1d   :  { %p615_p0 = por %p614_p13, %p613_p12 }
  0x1f   :  { %p616_p1 = pnand %p615_p0, %p609_p11 }
  0x21   :  { %619 = shalt.err (!%p616_p1)
}
  0x22   :  { %s652_s0 = smov 64   ;;  %s653_s9 = smov 4  }
  0x23   :  { %34 = dma.hbm_to_vmem [thread:$0]  %s721_s1, 4096, %s29_s27, [#allocation6], %s652_s0, %s652_s0, %s653_s9  }
  0x24   :  { %642 = dma.done.wait [#allocation3], 512  }
  0x25   :  { %643 = vsyncadd [#allocation3], 4294966784 }
  0x26   :  { %644 = dma.done.wait [#allocation6], 4096  }
  0x27   :  { %645 = vsyncadd [#allocation6], 4294963200  ;;  %v538_v0 = vld [vmem:[#allocation5 + $0x40] sm:$0xff]   ;;  %v542_v4 = vld [vmem:[#allocation5 + $0x48] sm:$0xff]   ;;  %s654_s13 = smov [#allocation7]  }
  0x28   :  { %v539_v1 = vld [vmem:[#allocation5 + $0xc0] sm:$0xff]   ;;  %487 = vmatprep.subr.bf16.mxu0 %v538_v0  ;;  %v543_v5 = vld [vmem:[#allocation5 + $0xc8] sm:$0xff]   ;;  %v546_v8 = vld [vmem:[#allocation5 + $0x50] sm:$0xff]   ;;  %s428_s14 = sshll.u32 %s654_s13, 4  ;;  %s429_s14 = int_to_ptr.vmem [resolvable:$true] %s428_s14 }
  0x29   :  { %v540_v2 = vld [vmem:[#allocation5] sm:$0xff]   ;;  %509 = vmatprep.subr.bf16.mxu1 %v539_v1  ;;  %v544_v6 = vld [vmem:[#allocation5 + $0x8] sm:$0xff]   ;;  %v547_v9 = vld [vmem:[#allocation5 + $0xd0] sm:$0xff]   ;;  %p625_p3 = scmp.lt.s32.totalorder %s429_s14, %s429_s14 }
  0x2a   :  { %v541_v3 = vld [vmem:[#allocation5 + $0x80] sm:$0xff]   ;;  %488 = vmatpush3.bf16.msra.mxu0 %v540_v2  ;;  %v545_v7 = vld [vmem:[#allocation5 + $0x88] sm:$0xff]   ;;  %v548_v10 = vld [vmem:[#allocation5 + $0x10] sm:$0xff]  }
  0x2b   :  { %510 = vmatpush3.bf16.msra.mxu1 %v541_v3  ;;  %489 = vmatprep.subr.bf16.mxu0 %v542_v4  ;;  %v549_v11 = vld [vmem:[#allocation5 + $0x90] sm:$0xff]   ;;  %v550_v12 = vld [vmem:[#allocation5 + $0x58] sm:$0xff]   ;;  %v554_v16 = vld [vmem:[#allocation5 + $0x60] sm:$0xff]  }
  0x2c   :  { %511 = vmatprep.subr.bf16.mxu1 %v543_v5  ;;  %v551_v13 = vld [vmem:[#allocation5 + $0xd8] sm:$0xff]   ;;  %v555_v17 = vld [vmem:[#allocation5 + $0xe0] sm:$0xff]   ;;  %v558_v20 = vld [vmem:[#allocation5 + $0x68] sm:$0xff]  }
  0x2d   :  { %v552_v14 = vld [vmem:[#allocation5 + $0x18] sm:$0xff]   ;;  %v556_v18 = vld [vmem:[#allocation5 + $0x20] sm:$0xff]   ;;  %v559_v21 = vld [vmem:[#allocation5 + $0xe8] sm:$0xff]  }
  0x2e   :  { %490 = vmatpush3.bf16.msra.mxu0 %v544_v6  ;;  %v553_v15 = vld [vmem:[#allocation5 + $0x98] sm:$0xff]   ;;  %v557_v19 = vld [vmem:[#allocation5 + $0xa0] sm:$0xff]   ;;  %v560_v22 = vld [vmem:[#allocation5 + $0x28] sm:$0xff]  }
  0x2f   :  { %512 = vmatpush3.bf16.msra.mxu1 %v545_v7  ;;  %491 = vmatprep.subr.bf16.mxu0 %v546_v8  ;;  %v561_v23 = vld [vmem:[#allocation5 + $0xa8] sm:$0xff]   ;;  %v562_v24 = vld [vmem:[#allocation5 + $0x70] sm:$0xff]   ;;  %v566_v28 = vld [vmem:[#allocation5 + $0x78] sm:$0xff]  }
  0x30   :  { %513 = vmatprep.subr.bf16.mxu1 %v547_v9  ;;  %v563_v25 = vld [vmem:[#allocation5 + $0xf0] sm:$0xff]   ;;  %v567_v29 = vld [vmem:[#allocation5 + $0xf8] sm:$0xff]   ;;  %v441_v38 = vld [vmem:[%s722_s2] ss:$0 sm:$0xff]  ;;  %s620_s2 = scalar_lea.vmem %s429_s14, 128 }
  0x31   :  { %v564_v26 = vld [vmem:[#allocation5 + $0x30] sm:$0xff]   ;;  %v568_v30 = vld [vmem:[#allocation5 + $0x38] sm:$0xff]   ;;  %p621_p2 = scmp.ne.s32.totalorder %s429_s14, %s620_s2  ;;  %p626_p4 = scmp.lt.s32.totalorder %s620_s2, %s620_s2 }
  0x32   :  { %492 = vmatpush3.bf16.msra.mxu0 %v548_v10  ;;  %v565_v27 = vld [vmem:[#allocation5 + $0xb0] sm:$0xff]   ;;  %v569_v31 = vld [vmem:[#allocation5 + $0xb8] sm:$0xff]  }
  0x33   :  { %514 = vmatpush3.bf16.msra.mxu1 %v549_v11  ;;  %493 = vmatprep.subr.bf16.mxu0 %v550_v12  ;;  %v570_v32 = vld [vmem:[#allocation2] ss:$16 sps:$4 sm:$0xff]   ;;  %v572_v33 = vld [vmem:[#allocation2 + $0x4] ss:$16 sps:$4 sm:$0xff]   ;;  %v573_v34 = vld [vmem:[#allocation2 + $0x8] ss:$16 sps:$4 sm:$0xff]   ;;  %p627_p5 = por %p626_p4, %p625_p3 }
  0x34   :  { %515 = vmatprep.subr.bf16.mxu1 %v551_v13  ;;  %v575_v35 = vld [vmem:[#allocation2 + $0xc] ss:$16 sps:$4 sm:$0xff]   ;;  %363 = vmatprep.mubr.bf16.mxu0 %v572_v33 }
  0x35   :  { %404 = vmatprep.mubr.bf16.mxu1 %v575_v35  ;;  %p628_p6 = pnand %p627_p5, %p621_p2 }
  0x36   :  { %494 = vmatpush3.bf16.msra.mxu0 %v552_v14 }
  0x37   :  { %516 = vmatpush3.bf16.msra.mxu1 %v553_v15  ;;  %495 = vmatprep.subr.bf16.mxu0 %v554_v16 }
  0x38   :  { %517 = vmatprep.subr.bf16.mxu1 %v555_v17 }
  0x3a   :  { %496 = vmatpush3.bf16.msra.mxu0 %v556_v18 }
  0x3b   :  { %518 = vmatpush3.bf16.msra.mxu1 %v557_v19  ;;  %497 = vmatprep.subr.bf16.mxu0 %v558_v20 }
  0x3c   :  { %519 = vmatprep.subr.bf16.mxu1 %v559_v21 }
  0x3e   :  { %498 = vmatpush3.bf16.msra.mxu0 %v560_v22 }
  0x3f   :  { %520 = vmatpush3.bf16.msra.mxu1 %v561_v23  ;;  %499 = vmatprep.subr.bf16.mxu0 %v562_v24 }
  0x40   :  { %521 = vmatprep.subr.bf16.mxu1 %v563_v25 }
  0x42   :  { %500 = vmatpush3.bf16.msra.mxu0 %v564_v26 }
  0x43   :  { %522 = vmatpush3.bf16.msra.mxu1 %v565_v27  ;;  %501 = vmatprep.subr.bf16.mxu0 %v566_v28 }
  0x44   :  { %523 = vmatprep.subr.bf16.mxu1 %v567_v29 }
  0x46   :  { %502 = vmatpush3.bf16.msra.mxu0 %v568_v30 }
  0x47   :  { %524 = vmatpush3.bf16.msra.mxu1 %v569_v31 }
  0x49   :  { %364 = vmatmul.mubr.bf16.vlgmr.msra.gmra.mrb[0].mxu0 %v570_v32 }
  0x4a   :  { %405 = vmatmul.mubr.bf16.vlgmr.msra.gmra.mrb[0].mxu1 %v573_v34 }
 0x11c   :  { %v503_v36 = vpop.f32.mrb[0].mxu0 }
 0x11d   :  { %v525_v37 = vpop.f32.mrb[0].mxu1  ;;  %v504_v39 = vpop.f32.mrb[1].mxu0 }
 0x11e   :  { %v505_v40 = vadd.f32 %v504_v39, %v503_v36  ;;  %v526_v41 = vpop.f32.mrb[1].mxu1  ;;  %v506_v42 = vpop.f32.mrb[2].mxu0 }
 0x11f   :  { %v527_v43 = vadd.f32 %v526_v41, %v525_v37  ;;  %v528_v44 = vpop.f32.mrb[2].mxu1  ;;  %v507_v45 = vpop.f32.mrb[3].mxu0 }
 0x120   :  { %v366_v46 = vadd.f32 %v505_v40, %v441_v38  ;;  %v508_v47 = vadd.f32 %v507_v45, %v506_v42  ;;  %v529_v48 = vpop.f32.mrb[3].mxu1 }
 0x121   :  { %v530_v49 = vadd.f32 %v529_v48, %v528_v44 }
 0x122   :  { %v407_v50 = vadd.f32 %v527_v43, %v366_v46  ;;  %v369_v51 = vadd.f32 %v508_v47, %v441_v38 }
 0x124   :  { %v410_v52 = vadd.f32 %v530_v49, %v369_v51 }
 0x126   :  { %v485_v53 = vpack.c.bf16 %v410_v52, %v407_v50 }
 0x128   :  { %486 = vst [vmem:[#allocation7] sm:$0xff] %v485_v53  }
 0x129   :  { %631 = shalt.err (!%p628_p6)
}
 0x12a   :  { %s632_s17 = scalar_lea.hbm %s723_s3, 128 }
 0x12b   :  { %p633_p7 = scmp.ne.s32.totalorder %s723_s3, %s632_s17  ;;  %p636_p8 = scmp.lt.u32.totalorder %s632_s17, %s723_s3 }
 0x12d   :  { %p638_p9 = pnand %p636_p8, %p633_p7 }
 0x12f   :  { %641 = shalt.err (!%p638_p9)
}
 0x130   :  { %434 = dma.vmem_to_hbm [thread:$0]  %s429_s14, 128, %s723_s3, [#allocation4], %s652_s0, %s652_s0, %s653_s9  }
 0x131   :  { %646 = dma.done.wait [#allocation4], 128  }
 0x132   :  { %647 = vsyncadd [#allocation4], 4294967168 }
 0x133   :  { %438 = vsyncpa [#allocation3], 1 }
 0x134   :  { %439 = vsyncpa [#allocation6], 1 }
 0x135   :  { %440 = vsyncpa [#allocation4], 1 }

</bundles_post_ra>
